<compile_context>
chip_gen: v5e
topology: v5e:2x2
jax: 0.10.0
libtpu: 0.0.40
codegen_flags: <defaults>
</compile_context>

<pallas_src>
import functools

import jax
import jax.numpy as jnp
from jax.experimental import pallas as pl
from jax.experimental.pallas import tpu as pltpu


def _round_up(n, m):
    return ((n + m - 1) // m) * m


def _addnorm_kernel(x_ref, y_ref, g_ref, b_ref, o_ref, *, eps):
    # "Add": elementwise residual sum, accumulated in f32.
    z = x_ref[...].astype(jnp.float32) + y_ref[...].astype(jnp.float32)

    # Two-pass LayerNorm statistics over the hidden dim (last dim of the
    # block == full hidden size, so no masking is needed and stats are exact).
    hidden = z.shape[-1]
    inv_h = 1.0 / float(hidden)
    mean = jnp.sum(z, axis=-1, keepdims=True) * inv_h
    d = z - mean
    var = jnp.sum(d * d, axis=-1, keepdims=True) * inv_h
    inv = jax.lax.rsqrt(var + eps)

    g = g_ref[...].astype(jnp.float32)
    b = b_ref[...].astype(jnp.float32)
    o_ref[...] = ((d * inv) * g + b).astype(o_ref.dtype)


def _vmem_capacity_bytes():
    """Generation-aware VMEM capacity with a conservative fallback."""
    try:
        return int(pltpu.get_tpu_info().vmem_capacity_bytes)
    except Exception:
        pass
    kind = ""
    try:
        kind = jax.devices()[0].device_kind.lower()
    except Exception:
        pass
    if ("v5" in kind) or ("v6" in kind):
        return 128 * 1024 * 1024
    return 64 * 1024 * 1024  # v7x-sized conservative default


def _pick_row_tile(rows, hidden, in_bytes, out_bytes, vmem_budget, max_tile):
    # Per-row VMEM footprint:
    #   double-buffered x and y input tiles + double-buffered output tile
    #   + ~5 f32 full-tile temporaries (casted x/y, z, d, scaled output).
    per_row = hidden * (2 * 2 * in_bytes + 2 * out_bytes + 5 * 4)
    tile = (vmem_budget // max(per_row, 1)) // 8 * 8
    tile = max(8, tile)
    tile = min(tile, max_tile)                 # diminishing returns past this
    tile = min(tile, _round_up(rows, 8))       # never tile past the data
    return int(tile)


def add_norm(x, sublayer_out, gamma, beta, *, eps=1e-6, row_tile=None):
    """LayerNorm(x + sublayer_out) over the last dim (PyTorch AddNorm).

    NOTE: the AddNorm spec defaults eps to 1e-6 (nn.LayerNorm's own default
    would be 1e-5); we follow the spec.
    """
    assert x.shape == sublayer_out.shape
    hidden = x.shape[-1]
    assert gamma.shape == (hidden,) and beta.shape == (hidden,)

    orig_shape = x.shape
    out_dtype = x.dtype                      # keep bf16 end-to-end if given bf16
    x2 = x.reshape(-1, hidden)
    y2 = sublayer_out.reshape(-1, hidden)
    rows = x2.shape[0]
    g2 = gamma.reshape(1, hidden)
    b2 = beta.reshape(1, hidden)

    vmem_cap = _vmem_capacity_bytes()
    vmem_budget = int(vmem_cap * 0.55)       # headroom for compiler scratch
    # 64 MiB-class chips (v7x): cap at 512 rows; 128 MiB (v5e/v6e): 1024.
    max_tile = 512 if vmem_cap <= 64 * 1024 * 1024 else 1024

    in_bytes = x2.dtype.itemsize
    out_bytes = jnp.dtype(out_dtype).itemsize
    if row_tile is None:
        row_tile = _pick_row_tile(rows, hidden, in_bytes, out_bytes,
                                  vmem_budget, max_tile)

    # Ragged last block (rows % row_tile != 0) is handled by Pallas: OOB rows
    # are garbage-in, per-row independent, and masked on the write back.
    grid = (pl.cdiv(rows, row_tile),)

    out2 = pl.pallas_call(
        functools.partial(_addnorm_kernel, eps=eps),
        out_shape=jax.ShapeDtypeStruct((rows, hidden), out_dtype),
        grid_spec=pltpu.PrefetchScalarGridSpec(
            num_scalar_prefetch=0,
            grid=grid,
            in_specs=[
                pl.BlockSpec((row_tile, hidden), lambda i: (i, 0)),
                pl.BlockSpec((row_tile, hidden), lambda i: (i, 0)),
                pl.BlockSpec((1, hidden), lambda i: (0, 0)),
                pl.BlockSpec((1, hidden), lambda i: (0, 0)),
            ],
            out_specs=pl.BlockSpec((row_tile, hidden), lambda i: (i, 0)),
        ),
        compiler_params=pltpu.CompilerParams(
            dimension_semantics=("parallel",),   # shards across v7x's 2 TCs
            vmem_limit_bytes=int(vmem_cap * 0.7),
        ),
    )(x2, y2, g2, b2)

    return out2.reshape(orig_shape)


if __name__ == "__main__":
    key = jax.random.PRNGKey(0)
    k1, k2 = jax.random.split(key)

    batch, seq, hidden = 2, 8, 32   # normalized_shape = hidden

    x = jax.random.normal(k1, (batch, seq, hidden), dtype=jnp.float32)
    sublayer_out = jax.random.normal(k2, (batch, seq, hidden), dtype=jnp.float32)

    # nn.LayerNorm default init: weight = 1, bias = 0 (deterministic)
    gamma = jnp.ones((hidden,), dtype=jnp.float32)
    beta = jnp.zeros((hidden,), dtype=jnp.float32)

    out = add_norm(x, sublayer_out, gamma, beta, eps=1e-6)
    out = jax.block_until_ready(out)

    # Reference check in plain JAX (same math as nn.LayerNorm over last dim)
    z = x + sublayer_out
    mean = jnp.mean(z, axis=-1, keepdims=True)
    var = jnp.mean((z - mean) ** 2, axis=-1, keepdims=True)
    ref = (z - mean) / jnp.sqrt(var + 1e-6) * gamma + beta
    assert out.shape == ref.shape
    assert jnp.allclose(out, ref, atol=1e-4, rtol=1e-4), "mismatch vs reference"

    print("KERNEL_OK")
</pallas_src>

<mosaic_0001>
module attributes {stable_mosaic.version = 11 : i64} {
  func.func @_addnorm_kernel(%arg0: i32, %arg1: memref<16x32xf32, #tpu.memory_space<vmem>>, %arg2: memref<16x32xf32, #tpu.memory_space<vmem>>, %arg3: memref<1x32xf32, #tpu.memory_space<vmem>>, %arg4: memref<1x32xf32, #tpu.memory_space<vmem>>, %arg5: memref<16x32xf32, #tpu.memory_space<vmem>>) attributes {dimension_semantics = [#tpu.dimension_semantics<parallel>], iteration_bounds = array<i64: 1>, scalar_prefetch = 0 : i64, scratch_operands = 0 : i64, tpu.core_type = #tpu.core_type<tc>, window_params = [{transform_indices = @transform_0, window_bounds = array<i64: 16, 32>}, {transform_indices = @transform_1, window_bounds = array<i64: 16, 32>}, {pipeline_mode = #tpu.pipeline_mode<synchronous>, transform_indices = @transform_2, window_bounds = array<i64: 1, 32>}, {pipeline_mode = #tpu.pipeline_mode<synchronous>, transform_indices = @transform_3, window_bounds = array<i64: 1, 32>}, {transform_indices = @transform_4, window_bounds = array<i64: 16, 32>}]} {
    %c0 = arith.constant 0 : index
    %c0_0 = arith.constant 0 : index
    %0 = vector.load %arg1[%c0, %c0_0] : memref<16x32xf32, #tpu.memory_space<vmem>>, vector<16x32xf32>
    %c0_1 = arith.constant 0 : index
    %c0_2 = arith.constant 0 : index
    %1 = vector.load %arg2[%c0_1, %c0_2] : memref<16x32xf32, #tpu.memory_space<vmem>>, vector<16x32xf32>
    %2 = arith.addf %0, %1 : vector<16x32xf32>
    %cst = arith.constant dense<0.000000e+00> : vector<16xf32>
    %3 = vector.multi_reduction <add>, %2, %cst [1] : vector<16x32xf32> to vector<16xf32>
    %4 = vector.shape_cast %3 : vector<16xf32> to vector<16x1xf32>
    %cst_3 = arith.constant 3.125000e-02 : f32
    %5 = vector.broadcast %cst_3 : f32 to vector<16x1xf32>
    %6 = arith.mulf %4, %5 : vector<16x1xf32>
    %7 = vector.broadcast %6 : vector<16x1xf32> to vector<16x32xf32>
    %8 = arith.subf %2, %7 : vector<16x32xf32>
    %9 = arith.mulf %8, %8 : vector<16x32xf32>
    %cst_4 = arith.constant dense<0.000000e+00> : vector<16xf32>
    %10 = vector.multi_reduction <add>, %9, %cst_4 [1] : vector<16x32xf32> to vector<16xf32>
    %11 = vector.shape_cast %10 : vector<16xf32> to vector<16x1xf32>
    %cst_5 = arith.constant 3.125000e-02 : f32
    %12 = vector.broadcast %cst_5 : f32 to vector<16x1xf32>
    %13 = arith.mulf %11, %12 : vector<16x1xf32>
    %cst_6 = arith.constant 9.99999997E-7 : f32
    %14 = vector.broadcast %cst_6 : f32 to vector<16x1xf32>
    %15 = arith.addf %13, %14 : vector<16x1xf32>
    %16 = math.rsqrt %15 : vector<16x1xf32>
    %c0_7 = arith.constant 0 : index
    %c0_8 = arith.constant 0 : index
    %17 = vector.load %arg3[%c0_7, %c0_8] : memref<1x32xf32, #tpu.memory_space<vmem>>, vector<1x32xf32>
    %c0_9 = arith.constant 0 : index
    %c0_10 = arith.constant 0 : index
    %18 = vector.load %arg4[%c0_9, %c0_10] : memref<1x32xf32, #tpu.memory_space<vmem>>, vector<1x32xf32>
    %19 = vector.broadcast %16 : vector<16x1xf32> to vector<16x32xf32>
    %20 = arith.mulf %8, %19 : vector<16x32xf32>
    %21 = vector.broadcast %17 : vector<1x32xf32> to vector<16x32xf32>
    %22 = arith.mulf %20, %21 : vector<16x32xf32>
    %23 = vector.broadcast %18 : vector<1x32xf32> to vector<16x32xf32>
    %24 = arith.addf %22, %23 : vector<16x32xf32>
    %c0_11 = arith.constant 0 : index
    %c0_12 = arith.constant 0 : index
    %25 = vector.load %arg5[%c0_11, %c0_12] : memref<16x32xf32, #tpu.memory_space<vmem>>, vector<16x32xf32>
    tpu.vector_store %arg5[%c0_11, %c0_12], %24 {strides = array<i32>} : memref<16x32xf32, #tpu.memory_space<vmem>>, vector<16x32xf32>,
    return
  }
  func.func @transform_0(%arg0: i32) -> (i32, i32) {
    %c0_i32 = arith.constant 0 : i32
    %c0_i32_0 = arith.constant 0 : i32
    return %arg0, %c0_i32 : i32, i32
  }
  func.func @transform_1(%arg0: i32) -> (i32, i32) {
    %c0_i32 = arith.constant 0 : i32
    %c0_i32_0 = arith.constant 0 : i32
    return %arg0, %c0_i32 : i32, i32
  }
  func.func @transform_2(%arg0: i32) -> (i32, i32) {
    %c0_i32 = arith.constant 0 : i32
    %c0_i32_0 = arith.constant 0 : i32
    %c0_i32_1 = arith.constant 0 : i32
    return %c0_i32, %c0_i32_0 : i32, i32
  }
  func.func @transform_3(%arg0: i32) -> (i32, i32) {
    %c0_i32 = arith.constant 0 : i32
    %c0_i32_0 = arith.constant 0 : i32
    %c0_i32_1 = arith.constant 0 : i32
    return %c0_i32, %c0_i32_0 : i32, i32
  }
  func.func @transform_4(%arg0: i32) -> (i32, i32) {
    %c0_i32 = arith.constant 0 : i32
    %c0_i32_0 = arith.constant 0 : i32
    return %arg0, %c0_i32 : i32, i32
  }
}

</mosaic_0001>

<bundles_post_ra>
// kernel: tpu_custom_call.1
= control target key start
LH: loop header
LB: loop body
LE: loop exit
PB: predicated region body
PF: predicated region fallthrough
CT: control target
= control target key end

     0   :  { %9 = vsyncpa [#allocation3], 0  ;;  %s284_s0 = inlined_call_operand.hbm [shape: f32[16,32], index: 0, kind: input, shape index: {}]   ;;  %s285_s1 = inlined_call_operand.hbm [shape: f32[16,32], index: 1, kind: input, shape index: {}]   ;;  %s286_s2 = inlined_call_operand.vmem [shape: f32[1,32], index: 2, kind: input, shape index: {}]   ;;  %s287_s3 = inlined_call_operand.vmem [shape: f32[1,32], index: 3, kind: input, shape index: {}]   ;;  %s288_s4 = inlined_call_operand.hbm [shape: f32[16,32], index: 4, kind: output, shape index: {}]  }
   0x1   :  { %10 = vsyncpa [#allocation6], 0 }
   0x2   :  { %11 = vsyncpa [#allocation4], 0  ;;  %s16_s17 = sshll.u32 %s284_s0, 4  ;;  %s224_s18 = smov [#allocation2]   ;;  %s17_s17 = int_to_ptr.hbm [resolvable:$true] %s16_s17 }
   0x3   :  { %s18_s19 = sshll.u32 %s224_s18, 4  ;;  %s29_s22 = sshll.u32 %s285_s1, 4  ;;  %s19_s19 = int_to_ptr.vmem [resolvable:$true] %s18_s19  ;;  %s30_s22 = int_to_ptr.hbm [resolvable:$true] %s29_s22 }
   0x4   :  { %s225_s23 = smov 128   ;;  %s226_s24 = smov 8  }
   0x5   :  { %24 = dma.hbm_to_vmem [thread:$0]  %s17_s17, 256, %s19_s19, [#allocation3], %s225_s23, %s225_s23, %s226_s24  }
   0x6   :  { %s227_s25 = smov [#allocation5]  }
   0x7   :  { %s31_s26 = sshll.u32 %s227_s25, 4  ;;  %s32_s26 = int_to_ptr.vmem [resolvable:$true] %s31_s26 }
   0x8   :  { %37 = dma.hbm_to_vmem [thread:$0]  %s30_s22, 256, %s32_s26, [#allocation6], %s225_s23, %s225_s23, %s226_s24  }
   0x9   :  { %218 = dma.done.wait [#allocation3], 256  }
   0xa   :  { %219 = vsyncadd [#allocation3], 4294967040 }
   0xb   :  { %220 = dma.done.wait [#allocation6], 256  }
   0xc   :  { %221 = vsyncadd [#allocation6], 4294967040  ;;  %v50_v0 = vld [vmem:[#allocation2] sm:$0xff]  ;;  %v52_v1 = vld [vmem:[#allocation5] sm:$0xff]  ;;  %vm56_vm0 = vcmask 261120   ;;  %s121_s6 = sshll.u32 %s288_s4, 4  ;;  %s122_s6 = int_to_ptr.hbm [resolvable:$true] %s121_s6 }
   0xd   :  { %v54_v2 = vadd.f32 %v52_v1, %v50_v0  ;;  %v51_v3 = vld [vmem:[#allocation2 + $0x8] sm:$0xff]  ;;  %v53_v4 = vld [vmem:[#allocation5 + $0x8] sm:$0xff]  ;;  %v140_v32 = vld [vmem:[%s286_s2] ss:$0 sm:$0xff]  ;;  %s228_s2 = smov [#allocation7]  }
   0xe   :  { %v55_v6 = vadd.f32 %v53_v4, %v51_v3  ;;  %v141_v36 = vld [vmem:[%s287_s3] ss:$0 sm:$0xff]  ;;  %s119_s29 = sshll.u32 %s228_s2, 4  ;;  %s120_s29 = int_to_ptr.vmem [resolvable:$true] %s119_s29 }
   0xf   :  { %v57_v5 = vsel %vm56_vm0, %v54_v2, 0.0 }
  0x10   :  { %58 = vadd.xlane.f32.xlu0 %v57_v5  ;;  %v60_v7 = vsel %vm56_vm0, %v55_v6, 0.0 }
  0x18   :  { %61 = vadd.xlane.f32.xlu0 %v60_v7 }
  0x83   :  { %v59_v8 = vpop.xlane.xlu0 %58 }
  0x84   :  { %v63_v9 = vmul.f32 0.03125, %v59_v8 }
  0x86   :  { %v65_v10 = vsub.f32 %v54_v2, %v63_v9 }
  0x88   :  { %v67_v11 = vmul.f32 %v65_v10, %v65_v10 }
  0x8a   :  { %v69_v12 = vsel %vm56_vm0, %v67_v11, 0.0 }
  0x8b   :  { %70 = vadd.xlane.f32.xlu1 %v69_v12  ;;  %v62_v13 = vpop.xlane.xlu0 %61 }
  0x8c   :  { %v64_v14 = vmul.f32 0.03125, %v62_v13 }
  0x8e   :  { %v66_v15 = vsub.f32 %v55_v6, %v64_v14 }
  0x90   :  { %v68_v16 = vmul.f32 %v66_v15, %v66_v15 }
  0x92   :  { %v72_v17 = vsel %vm56_vm0, %v68_v16, 0.0 }
  0x93   :  { %73 = vadd.xlane.f32.xlu1 %v72_v17 }
  0xfe   :  { %v71_v18 = vpop.xlane.xlu1 %70 }
  0xff   :  { %v75_v19 = vmul.f32 0.03125, %v71_v18 }
 0x101   :  { %v77_v20 = vadd.f32 1e-06, %v75_v19 }
 0x103   :  { %142 = vrsqrt.f32 %v77_v20  ;;  %vm85_vm2 = vweird.f32 %v77_v20 }
 0x106   :  { %v74_v21 = vpop.xlane.xlu1 %73 }
 0x107   :  { %v76_v22 = vmul.f32 0.03125, %v74_v21 }
 0x109   :  { %v143_v23 = vpop.eup %142  ;;  %v78_v24 = vadd.f32 1e-06, %v76_v22 }
 0x10a   :  { %v80_v25 = vmul.f32 %v143_v23, %v77_v20  ;;  %vm86_vm1 = vweird.f32 %v143_v23 }
 0x10b   :  { %144 = vrsqrt.f32 %v78_v24  ;;  %vm87_vm3 = vmor %vm85_vm2, %vm86_vm1  ;;  %vm95_vm5 = vweird.f32 %v78_v24 }
 0x10c   :  { %v81_v26 = vmul.f32 %v143_v23, %v80_v25 }
 0x10e   :  { %v82_v27 = vmul.f32 0.5, %v81_v26 }
 0x110   :  { %v83_v28 = vsub.f32 1.5, %v82_v27 }
 0x111   :  { %v145_v29 = vpop.eup %144 }
 0x112   :  { %v84_v30 = vmul.f32 %v143_v23, %v83_v28  ;;  %v90_v31 = vmul.f32 %v145_v29, %v78_v24  ;;  %vm96_vm4 = vweird.f32 %v145_v29 }
 0x113   :  { %vm97_vm6 = vmor %vm95_vm5, %vm96_vm4 }
 0x114   :  { %v88_v33 = vsel %vm87_vm3, %v143_v23, %v84_v30  ;;  %v91_v34 = vmul.f32 %v145_v29, %v90_v31 }
 0x115   :  { %v101_v35 = vmul.f32 %v88_v33, %v65_v10 }
 0x116   :  { %v92_v37 = vmul.f32 0.5, %v91_v34 }
 0x117   :  { %v106_v38 = vmul.f32 %v140_v32, %v101_v35 }
 0x118   :  { %v93_v39 = vsub.f32 1.5, %v92_v37 }
 0x119   :  { %v111_v40 = vadd.f32 %v141_v36, %v106_v38 }
 0x11a   :  { %v94_v41 = vmul.f32 %v145_v29, %v93_v39 }
 0x11b   :  { %113 = vst.msk [vmem:[#allocation7] sm:$0xff] %vm56_vm0, %v111_v40 }
 0x11c   :  { %v98_v42 = vsel %vm97_vm6, %v145_v29, %v94_v41 }
 0x11d   :  { %v102_v43 = vmul.f32 %v98_v42, %v66_v15 }
 0x11f   :  { %v107_v44 = vmul.f32 %v140_v32, %v102_v43 }
 0x121   :  { %v112_v45 = vadd.f32 %v141_v36, %v107_v44 }
 0x123   :  { %114 = vst.msk [vmem:[#allocation7 + $0x8] sm:$0xff] %vm56_vm0, %v112_v45 }
 0x124   :  { %127 = dma.vmem_to_hbm [thread:$0]  %s120_s29, 256, %s122_s6, [#allocation4], %s225_s23, %s225_s23, %s226_s24  }
 0x125   :  { %222 = dma.done.wait [#allocation4], 256  }
 0x126   :  { %223 = vsyncadd [#allocation4], 4294967040 }
 0x127   :  { %132 = vsyncpa [#allocation3], 1 }
 0x128   :  { %133 = vsyncpa [#allocation6], 1 }
 0x129   :  { %134 = vsyncpa [#allocation4], 1 }

</bundles_post_ra>
